<compile_context>
chip_gen: v7x
topology: tpu7x:2x2x1
jax: 0.10.0
libtpu: 0.0.40
codegen_flags: <defaults>
</compile_context>

<pallas_src>
import functools

import jax
import jax.numpy as jnp
import numpy as np
from jax.experimental import pallas as pl
from jax.experimental.pallas import tpu as pltpu

LEAKY_SLOPE = 0.01  # torch.nn.LeakyReLU() default negative_slope


def _round_up(x, m):
    return (x + m - 1) // m * m


# ----------------------------------------------------------------------------
# Pallas kernels: matmul + bias + [residual] + LeakyReLU on one (TM, *) tile
# ----------------------------------------------------------------------------
def _matmul_bias_lrelu_kernel(p_ref, w_ref, b_ref, o_ref):
    acc = jnp.dot(p_ref[...], w_ref[...], preferred_element_type=jnp.float32)
    acc = acc + b_ref[...]
    o_ref[...] = jnp.where(acc > 0, acc, LEAKY_SLOPE * acc).astype(o_ref.dtype)


def _matmul_bias_add_lrelu_kernel(p_ref, w_ref, b_ref, r_ref, o_ref):
    acc = jnp.dot(p_ref[...], w_ref[...], preferred_element_type=jnp.float32)
    acc = acc + b_ref[...] + r_ref[...]
    o_ref[...] = jnp.where(acc > 0, acc, LEAKY_SLOPE * acc).astype(o_ref.dtype)


# ----------------------------------------------------------------------------
# Gridded fused conv-as-matmul launcher
# ----------------------------------------------------------------------------
def _fused_conv_matmul(patches, w2d, bias, residual=None, *, tm=512):
    """patches: (M, K) f32, w2d: (K, C) f32, bias: (C,) f32,
    residual: optional (M, C) f32. Returns (M, C) f32."""
    M, K = patches.shape
    C = w2d.shape[1]

    # Pad contraction and output-channel axes to lane width (128) and rows to
    # the tile size -> dense vld / vst, clean MXU passes, exact-grid tiling.
    Kp = _round_up(K, 128)
    Cp = _round_up(C, 128)
    TM = min(tm, _round_up(M, 8))
    Mp = _round_up(M, TM)

    p = jnp.pad(patches, ((0, Mp - M), (0, Kp - K)))
    w = jnp.pad(w2d, ((0, Kp - K), (0, Cp - C)))
    b = jnp.pad(bias.reshape(1, C), ((0, 0), (0, Cp - C)))

    args = [p, w, b]
    in_specs = [
        pl.BlockSpec((TM, Kp), lambda i: (i, 0)),   # streamed row tiles
        pl.BlockSpec((Kp, Cp), lambda i: (0, 0)),   # weights: VMEM-resident
        pl.BlockSpec((1, Cp), lambda i: (0, 0)),    # bias:    VMEM-resident
    ]
    if residual is not None:
        r = jnp.pad(residual, ((0, Mp - M), (0, Cp - C)))
        args.append(r)
        in_specs.append(pl.BlockSpec((TM, Cp), lambda i: (i, 0)))
        kernel = _matmul_bias_add_lrelu_kernel
    else:
        kernel = _matmul_bias_lrelu_kernel

    grid = (Mp // TM,)
    out = pl.pallas_call(
        kernel,
        out_shape=jax.ShapeDtypeStruct((Mp, Cp), jnp.float32),
        grid=grid,
        in_specs=in_specs,
        out_specs=pl.BlockSpec((TM, Cp), lambda i: (i, 0)),
        compiler_params=pltpu.CompilerParams(
            dimension_semantics=("parallel",),          # 2 TCs on v7x
            vmem_limit_bytes=32 * 1024 * 1024),
        cost_estimate=pl.CostEstimate(
            flops=2 * Mp * Kp * Cp,
            transcendentals=0,
            bytes_accessed=4 * (Mp * Kp + Kp * Cp + Mp * Cp
                                + (Mp * Cp if residual is not None else 0))),
    )(*args)
    return out[:M, :C]


# ----------------------------------------------------------------------------
# im2col (single fused XLA patch-extraction, feature order = (Cin, KH, KW))
# ----------------------------------------------------------------------------
def _im2col(x_nhwc, kh, kw, stride, pad):
    n, h, w, c = x_nhwc.shape
    patches = jax.lax.conv_general_dilated_patches(
        x_nhwc,
        filter_shape=(kh, kw),
        window_strides=(stride, stride),
        padding=[(pad, pad), (pad, pad)],
        dimension_numbers=("NHWC", "HWIO", "NHWC"))
    ho = (h + 2 * pad - kh) // stride + 1
    wo = (w + 2 * pad - kw) // stride + 1
    return patches.reshape(n * ho * wo, c * kh * kw), ho, wo


def _weight_to_2d(w_hwio):
    # match conv_general_dilated_patches feature order: index = c*KH*KW + i*KW + j
    kh, kw, cin, cout = w_hwio.shape
    return jnp.transpose(w_hwio, (2, 0, 1, 3)).reshape(cin * kh * kw, cout)


# ----------------------------------------------------------------------------
# Conv wrappers
# ----------------------------------------------------------------------------
def conv_lrelu(x_nhwc, w_hwio, b, stride, pad):
    kh, kw, cin, cout = w_hwio.shape
    n = x_nhwc.shape[0]
    patches, ho, wo = _im2col(x_nhwc, kh, kw, stride, pad)
    out = _fused_conv_matmul(patches, _weight_to_2d(w_hwio), b)
    return out.reshape(n, ho, wo, cout)


def conv_add_lrelu(x_nhwc, w_hwio, b, residual_nhwc, stride, pad):
    kh, kw, cin, cout = w_hwio.shape
    n = x_nhwc.shape[0]
    patches, ho, wo = _im2col(x_nhwc, kh, kw, stride, pad)
    res2d = residual_nhwc.reshape(n * ho * wo, cout)
    out = _fused_conv_matmul(patches, _weight_to_2d(w_hwio), b, residual=res2d)
    return out.reshape(n, ho, wo, cout)


# ----------------------------------------------------------------------------
# Module forward
# ----------------------------------------------------------------------------
def residual_block(x_nhwc, params):
    # conv_1 -> lrelu -> conv_2 (+x) -> lrelu      (kernel 3, stride 1, pad 1)
    h = conv_lrelu(x_nhwc, params["w1"], params["b1"], stride=1, pad=1)
    return conv_add_lrelu(h, params["w2"], params["b2"], x_nhwc, stride=1, pad=1)


def block_forward(x_nchw, params):
    x = jnp.transpose(x_nchw, (0, 2, 3, 1))  # NCHW -> NHWC
    # conv_1: kernel 4, stride 2, pad 1, then LeakyReLU
    h = conv_lrelu(x, params["conv1_w"], params["conv1_b"], stride=2, pad=1)
    h = residual_block(h, params["rb1"])
    h = residual_block(h, params["rb2"])
    return jnp.transpose(h, (0, 3, 1, 2))  # NHWC -> NCHW


# ----------------------------------------------------------------------------
# Pure-JAX reference (correctness check of the kernel path)
# ----------------------------------------------------------------------------
def _conv_ref(x_nhwc, w_hwio, b, stride, pad):
    y = jax.lax.conv_general_dilated(
        x_nhwc, w_hwio, window_strides=(stride, stride),
        padding=[(pad, pad), (pad, pad)],
        dimension_numbers=("NHWC", "HWIO", "NHWC"))
    return y + b[None, None, None, :]


def _lrelu(x):
    return jnp.where(x > 0, x, LEAKY_SLOPE * x)


def block_forward_ref(x_nchw, params):
    x = jnp.transpose(x_nchw, (0, 2, 3, 1))
    h = _lrelu(_conv_ref(x, params["conv1_w"], params["conv1_b"], 2, 1))
    for rb in ("rb1", "rb2"):
        p = params[rb]
        t = _lrelu(_conv_ref(h, p["w1"], p["b1"], 1, 1))
        h = _lrelu(_conv_ref(t, p["w2"], p["b2"], 1, 1) + h)
    return jnp.transpose(h, (0, 3, 1, 2))


# ----------------------------------------------------------------------------
# Deterministic parameter init
# ----------------------------------------------------------------------------
def init_params(key, in_channels, out_channels, conv_kernel_size=4, kernel_size=3):
    ks = jax.random.split(key, 10)

    def w(k, kh, kw, cin, cout):
        scale = 1.0 / np.sqrt(kh * kw * cin)
        return scale * jax.random.normal(k, (kh, kw, cin, cout), jnp.float32)

    def b(k, cout):
        return 0.05 * jax.random.normal(k, (cout,), jnp.float32)

    return {
        "conv1_w": w(ks[0], conv_kernel_size, conv_kernel_size, in_channels, out_channels),
        "conv1_b": b(ks[1], out_channels),
        "rb1": {
            "w1": w(ks[2], kernel_size, kernel_size, out_channels, out_channels),
            "b1": b(ks[3], out_channels),
            "w2": w(ks[4], kernel_size, kernel_size, out_channels, out_channels),
            "b2": b(ks[5], out_channels),
        },
        "rb2": {
            "w1": w(ks[6], kernel_size, kernel_size, out_channels, out_channels),
            "b1": b(ks[7], out_channels),
            "w2": w(ks[8], kernel_size, kernel_size, out_channels, out_channels),
            "b2": b(ks[9], out_channels),
        },
    }


if __name__ == "__main__":
    key = jax.random.PRNGKey(0)
    k_x, k_p = jax.random.split(key)

    N, Cin, H, W = 2, 4, 16, 16
    Cout = 8

    x = jax.random.normal(k_x, (N, Cin, H, W), jnp.float32)  # NCHW like PyTorch
    params = init_params(k_p, Cin, Cout)

    fwd = jax.jit(functools.partial(block_forward, params=params))
    out = fwd(x)
    out = jax.block_until_ready(out)

    # conv_1 halves spatial dims (k=4, s=2, p=1): (2, 8, 8, 8)
    assert out.shape == (N, Cout, H // 2, W // 2), out.shape

    ref = jax.block_until_ready(block_forward_ref(x, params))
    np.testing.assert_allclose(np.asarray(out), np.asarray(ref), rtol=1e-4, atol=1e-4)

    print("KERNEL_OK")
</pallas_src>

<mosaic_0001>
module attributes {stable_mosaic.version = 11 : i64} {
  func.func @_matmul_bias_lrelu_kernel(%arg0: i32, %arg1: memref<128x128xf32, #tpu.memory_space<vmem>>, %arg2: memref<128x128xf32, #tpu.memory_space<vmem>>, %arg3: memref<1x128xf32, #tpu.memory_space<vmem>>, %arg4: memref<128x128xf32, #tpu.memory_space<vmem>>) attributes {dimension_semantics = [#tpu.dimension_semantics<parallel>], iteration_bounds = array<i64: 1>, scalar_prefetch = 0 : i64, scratch_operands = 0 : i64, tpu.core_type = #tpu.core_type<tc>, window_params = [{transform_indices = @transform_0, window_bounds = array<i64: 128, 128>}, {pipeline_mode = #tpu.pipeline_mode<synchronous>, transform_indices = @transform_1, window_bounds = array<i64: 128, 128>}, {pipeline_mode = #tpu.pipeline_mode<synchronous>, transform_indices = @transform_2, window_bounds = array<i64: 1, 128>}, {transform_indices = @transform_3, window_bounds = array<i64: 128, 128>}]} {
    %c0 = arith.constant 0 : index
    %c0_0 = arith.constant 0 : index
    %0 = vector.load %arg1[%c0, %c0_0] : memref<128x128xf32, #tpu.memory_space<vmem>>, vector<128x128xf32>
    %c0_1 = arith.constant 0 : index
    %c0_2 = arith.constant 0 : index
    %1 = vector.load %arg2[%c0_1, %c0_2] : memref<128x128xf32, #tpu.memory_space<vmem>>, vector<128x128xf32>
    %cst = arith.constant dense<0.000000e+00> : vector<128x128xf32>
    %2 = tpu.matmul %0, %1, %cst {dimension_numbers = #tpu.dot_dimension_numbers<[1], [0], [0], [1], [0, 0, 1, 1], [], []>} : vector<128x128xf32>, vector<128x128xf32>, vector<128x128xf32> -> vector<128x128xf32>
    %c0_3 = arith.constant 0 : index
    %c0_4 = arith.constant 0 : index
    %3 = vector.load %arg3[%c0_3, %c0_4] : memref<1x128xf32, #tpu.memory_space<vmem>>, vector<1x128xf32>
    %4 = vector.broadcast %3 : vector<1x128xf32> to vector<128x128xf32>
    %5 = arith.addf %2, %4 : vector<128x128xf32>
    %cst_5 = arith.constant 0.000000e+00 : f32
    %6 = vector.broadcast %cst_5 : f32 to vector<128x128xf32>
    %7 = arith.cmpf ogt, %5, %6 : vector<128x128xf32>
    %cst_6 = arith.constant 0.00999999977 : f32
    %8 = vector.broadcast %cst_6 : f32 to vector<128x128xf32>
    %9 = arith.mulf %8, %5 : vector<128x128xf32>
    %10 = arith.select %7, %5, %9 : vector<128x128xi1>, vector<128x128xf32>
    %c0_7 = arith.constant 0 : index
    %c0_8 = arith.constant 0 : index
    %11 = vector.load %arg4[%c0_7, %c0_8] : memref<128x128xf32, #tpu.memory_space<vmem>>, vector<128x128xf32>
    tpu.vector_store %arg4[%c0_7, %c0_8], %10 {strides = array<i32>} : memref<128x128xf32, #tpu.memory_space<vmem>>, vector<128x128xf32>,
    return
  }
  func.func @transform_0(%arg0: i32) -> (i32, i32) {
    %c0_i32 = arith.constant 0 : i32
    %c0_i32_0 = arith.constant 0 : i32
    return %arg0, %c0_i32 : i32, i32
  }
  func.func @transform_1(%arg0: i32) -> (i32, i32) {
    %c0_i32 = arith.constant 0 : i32
    %c0_i32_0 = arith.constant 0 : i32
    %c0_i32_1 = arith.constant 0 : i32
    return %c0_i32, %c0_i32_0 : i32, i32
  }
  func.func @transform_2(%arg0: i32) -> (i32, i32) {
    %c0_i32 = arith.constant 0 : i32
    %c0_i32_0 = arith.constant 0 : i32
    %c0_i32_1 = arith.constant 0 : i32
    return %c0_i32, %c0_i32_0 : i32, i32
  }
  func.func @transform_3(%arg0: i32) -> (i32, i32) {
    %c0_i32 = arith.constant 0 : i32
    %c0_i32_0 = arith.constant 0 : i32
    return %arg0, %c0_i32 : i32, i32
  }
}

module attributes {stable_mosaic.version = 11 : i64} {
  func.func @_matmul_bias_add_lrelu_kernel(%arg0: i32, %arg1: memref<128x128xf32, #tpu.memory_space<vmem>>, %arg2: memref<128x128xf32, #tpu.memory_space<vmem>>, %arg3: memref<1x128xf32, #tpu.memory_space<vmem>>, %arg4: memref<128x128xf32, #tpu.memory_space<vmem>>, %arg5: memref<128x128xf32, #tpu.memory_space<vmem>>) attributes {dimension_semantics = [#tpu.dimension_semantics<parallel>], iteration_bounds = array<i64: 1>, scalar_prefetch = 0 : i64, scratch_operands = 0 : i64, tpu.core_type = #tpu.core_type<tc>, window_params = [{transform_indices = @transform_0, window_bounds = array<i64: 128, 128>}, {pipeline_mode = #tpu.pipeline_mode<synchronous>, transform_indices = @transform_1, window_bounds = array<i64: 128, 128>}, {pipeline_mode = #tpu.pipeline_mode<synchronous>, transform_indices = @transform_2, window_bounds = array<i64: 1, 128>}, {transform_indices = @transform_3, window_bounds = array<i64: 128, 128>}, {transform_indices = @transform_4, window_bounds = array<i64: 128, 128>}]} {
    %c0 = arith.constant 0 : index
    %c0_0 = arith.constant 0 : index
    %0 = vector.load %arg1[%c0, %c0_0] : memref<128x128xf32, #tpu.memory_space<vmem>>, vector<128x128xf32>
    %c0_1 = arith.constant 0 : index
    %c0_2 = arith.constant 0 : index
    %1 = vector.load %arg2[%c0_1, %c0_2] : memref<128x128xf32, #tpu.memory_space<vmem>>, vector<128x128xf32>
    %cst = arith.constant dense<0.000000e+00> : vector<128x128xf32>
    %2 = tpu.matmul %0, %1, %cst {dimension_numbers = #tpu.dot_dimension_numbers<[1], [0], [0], [1], [0, 0, 1, 1], [], []>} : vector<128x128xf32>, vector<128x128xf32>, vector<128x128xf32> -> vector<128x128xf32>
    %c0_3 = arith.constant 0 : index
    %c0_4 = arith.constant 0 : index
    %3 = vector.load %arg3[%c0_3, %c0_4] : memref<1x128xf32, #tpu.memory_space<vmem>>, vector<1x128xf32>
    %4 = vector.broadcast %3 : vector<1x128xf32> to vector<128x128xf32>
    %5 = arith.addf %2, %4 : vector<128x128xf32>
    %c0_5 = arith.constant 0 : index
    %c0_6 = arith.constant 0 : index
    %6 = vector.load %arg4[%c0_5, %c0_6] : memref<128x128xf32, #tpu.memory_space<vmem>>, vector<128x128xf32>
    %7 = arith.addf %5, %6 : vector<128x128xf32>
    %cst_7 = arith.constant 0.000000e+00 : f32
    %8 = vector.broadcast %cst_7 : f32 to vector<128x128xf32>
    %9 = arith.cmpf ogt, %7, %8 : vector<128x128xf32>
    %cst_8 = arith.constant 0.00999999977 : f32
    %10 = vector.broadcast %cst_8 : f32 to vector<128x128xf32>
    %11 = arith.mulf %10, %7 : vector<128x128xf32>
    %12 = arith.select %9, %7, %11 : vector<128x128xi1>, vector<128x128xf32>
    %c0_9 = arith.constant 0 : index
    %c0_10 = arith.constant 0 : index
    %13 = vector.load %arg5[%c0_9, %c0_10] : memref<128x128xf32, #tpu.memory_space<vmem>>, vector<128x128xf32>
    tpu.vector_store %arg5[%c0_9, %c0_10], %12 {strides = array<i32>} : memref<128x128xf32, #tpu.memory_space<vmem>>, vector<128x128xf32>,
    return
  }
  func.func @transform_0(%arg0: i32) -> (i32, i32) {
    %c0_i32 = arith.constant 0 : i32
    %c0_i32_0 = arith.constant 0 : i32
    return %arg0, %c0_i32 : i32, i32
  }
  func.func @transform_1(%arg0: i32) -> (i32, i32) {
    %c0_i32 = arith.constant 0 : i32
    %c0_i32_0 = arith.constant 0 : i32
    %c0_i32_1 = arith.constant 0 : i32
    return %c0_i32, %c0_i32_0 : i32, i32
  }
  func.func @transform_2(%arg0: i32) -> (i32, i32) {
    %c0_i32 = arith.constant 0 : i32
    %c0_i32_0 = arith.constant 0 : i32
    %c0_i32_1 = arith.constant 0 : i32
    return %c0_i32, %c0_i32_0 : i32, i32
  }
  func.func @transform_3(%arg0: i32) -> (i32, i32) {
    %c0_i32 = arith.constant 0 : i32
    %c0_i32_0 = arith.constant 0 : i32
    return %arg0, %c0_i32 : i32, i32
  }
  func.func @transform_4(%arg0: i32) -> (i32, i32) {
    %c0_i32 = arith.constant 0 : i32
    %c0_i32_0 = arith.constant 0 : i32
    return %arg0, %c0_i32 : i32, i32
  }
}

</mosaic_0001>

<bundles_post_ra>
// kernel: block_forward.5
= control target key start
LH: loop header
LB: loop body
LE: loop exit
PB: predicated region body
PF: predicated region fallthrough
CT: control target
= control target key end

     0   :  { %s588_s1 = inlined_call_operand.vmem [shape: f32[128,128], index: 1, kind: input, shape index: {}]   ;;  %s589_s0 = inlined_call_operand.vmem [shape: f32[128,128], index: 0, kind: input, shape index: {}]   ;;  %s590_s2 = inlined_call_operand.vmem [shape: f32[1,128], index: 2, kind: input, shape index: {}]   ;;  %s591_s3 = inlined_call_operand.vmem [shape: f32[128,128], index: 3, kind: output, shape index: {}]  }
   0x1   :  { %v30_v0 = vld [vmem:[%s588_s1] sm:$0xff]  ;;  %v31_v1 = vld [vmem:[%s588_s1 + $0x8] sm:$0xff]  ;;  %v32_v2 = vld [vmem:[%s588_s1 + $0x10] sm:$0xff] }
   0x2   :  { %v355_v3 = vpack.c.bf16 %v31_v1, %v30_v0  ;;  %v33_v4 = vld [vmem:[%s588_s1 + $0x18] sm:$0xff]  ;;  %v34_v6 = vld [vmem:[%s588_s1 + $0x20] sm:$0xff]  ;;  %v35_v7 = vld [vmem:[%s588_s1 + $0x28] sm:$0xff] }
   0x3   :  { %v359_v5 = vpack.c.bf16 %v33_v4, %v32_v2  ;;  %v363_v8 = vpack.c.bf16 %v35_v7, %v34_v6  ;;  %v14_v9 = vld [vmem:[%s589_s0] sm:$0xff]  ;;  %v36_v11 = vld [vmem:[%s588_s1 + $0x30] sm:$0xff]  ;;  %v37_v12 = vld [vmem:[%s588_s1 + $0x38] sm:$0xff] }
   0x4   :  { %356 = vmatprep.subr.bf16.mxu0 %v355_v3  ;;  %387 = vmatprep.subr.bf16.mxu1 %v355_v3  ;;  %v22_v10 = vld [vmem:[%s589_s0 + $0x40] sm:$0xff]  ;;  %v367_v13 = vpack.c.bf16 %v37_v12, %v36_v11  ;;  %v39_v15 = vld [vmem:[%s588_s1 + $0x48] sm:$0xff]  ;;  %v40_v17 = vld [vmem:[%s588_s1 + $0x50] sm:$0xff] }
   0x5   :  { %358 = vmatpush3.bf16.msra.mxu0 %v355_v3  ;;  %395 = vmatpush3.bf16.msra.mxu1 %v355_v3  ;;  %v38_v14 = vld [vmem:[%s588_s1 + $0x40] sm:$0xff]  ;;  %v41_v18 = vld [vmem:[%s588_s1 + $0x58] sm:$0xff]  ;;  %v43_v21 = vld [vmem:[%s588_s1 + $0x68] sm:$0xff] }
   0x6   :  { %360 = vmatprep.subr.bf16.mxu0 %v359_v5  ;;  %388 = vmatprep.subr.bf16.mxu1 %v359_v5  ;;  %v371_v16 = vpack.c.bf16 %v39_v15, %v38_v14  ;;  %v375_v19 = vpack.c.bf16 %v41_v18, %v40_v17  ;;  %v42_v20 = vld [vmem:[%s588_s1 + $0x60] sm:$0xff]  ;;  %v44_v23 = vld [vmem:[%s588_s1 + $0x70] sm:$0xff]  ;;  %v45_v24 = vld [vmem:[%s588_s1 + $0x78] sm:$0xff] }
   0x7   :  { %331 = vmatprep.mubr.f32.mxu0 %v14_v9  ;;  %343 = vmatprep.mubr.f32.mxu1 %v22_v10  ;;  %v379_v22 = vpack.c.bf16 %v43_v21, %v42_v20  ;;  %v383_v25 = vpack.c.bf16 %v45_v24, %v44_v23  ;;  %v15_v26 = vld [vmem:[%s589_s0 + $0x8] sm:$0xff]  ;;  %v16_v28 = vld [vmem:[%s589_s0 + $0x10] sm:$0xff]  ;;  %v17_v30 = vld [vmem:[%s589_s0 + $0x18] sm:$0xff] }
   0x8   :  { %v23_v27 = vld [vmem:[%s589_s0 + $0x48] sm:$0xff]  ;;  %v24_v29 = vld [vmem:[%s589_s0 + $0x50] sm:$0xff]  ;;  %v25_v31 = vld [vmem:[%s589_s0 + $0x58] sm:$0xff] }
   0x9   :  { %362 = vmatpush3.bf16.msra.mxu0 %v359_v5  ;;  %396 = vmatpush3.bf16.msra.mxu1 %v359_v5  ;;  %v18_v32 = vld [vmem:[%s589_s0 + $0x20] sm:$0xff]  ;;  %v19_v34 = vld [vmem:[%s589_s0 + $0x28] sm:$0xff]  ;;  %v20_v36 = vld [vmem:[%s589_s0 + $0x30] sm:$0xff] }
   0xa   :  { %364 = vmatprep.subr.bf16.mxu0 %v363_v8  ;;  %389 = vmatprep.subr.bf16.mxu1 %v363_v8  ;;  %v26_v33 = vld [vmem:[%s589_s0 + $0x60] sm:$0xff]  ;;  %v27_v35 = vld [vmem:[%s589_s0 + $0x68] sm:$0xff]  ;;  %v28_v37 = vld [vmem:[%s589_s0 + $0x70] sm:$0xff] }
   0xb   :  { %v21_v38 = vld [vmem:[%s589_s0 + $0x38] sm:$0xff]  ;;  %v522_v40 = vld [vmem:[%s590_s2] ss:$0 sm:$0xff] }
   0xc   :  { %v29_v39 = vld [vmem:[%s589_s0 + $0x78] sm:$0xff] }
   0xd   :  { %366 = vmatpush3.bf16.msra.mxu0 %v363_v8  ;;  %397 = vmatpush3.bf16.msra.mxu1 %v363_v8 }
   0xe   :  { %368 = vmatprep.subr.bf16.mxu0 %v367_v13  ;;  %390 = vmatprep.subr.bf16.mxu1 %v367_v13 }
  0x11   :  { %370 = vmatpush3.bf16.msra.mxu0 %v367_v13  ;;  %398 = vmatpush3.bf16.msra.mxu1 %v367_v13 }
  0x12   :  { %372 = vmatprep.subr.bf16.mxu0 %v371_v16  ;;  %391 = vmatprep.subr.bf16.mxu1 %v371_v16 }
  0x15   :  { %374 = vmatpush3.bf16.msra.mxu0 %v371_v16  ;;  %399 = vmatpush3.bf16.msra.mxu1 %v371_v16 }
  0x16   :  { %376 = vmatprep.subr.bf16.mxu0 %v375_v19  ;;  %392 = vmatprep.subr.bf16.mxu1 %v375_v19 }
  0x19   :  { %378 = vmatpush3.bf16.msra.mxu0 %v375_v19  ;;  %400 = vmatpush3.bf16.msra.mxu1 %v375_v19 }
  0x1a   :  { %380 = vmatprep.subr.bf16.mxu0 %v379_v22  ;;  %393 = vmatprep.subr.bf16.mxu1 %v379_v22 }
  0x1d   :  { %382 = vmatpush3.bf16.msra.mxu0 %v379_v22  ;;  %401 = vmatpush3.bf16.msra.mxu1 %v379_v22 }
  0x1e   :  { %384 = vmatprep.subr.bf16.mxu0 %v383_v25  ;;  %394 = vmatprep.subr.bf16.mxu1 %v383_v25 }
  0x21   :  { %386 = vmatpush3.bf16.msra.mxu0 %v383_v25  ;;  %402 = vmatpush3.bf16.msra.mxu1 %v383_v25 }
  0x24   :  { %332 = vmatmul.mubr.f32.vlgmr.msra.gmra.mrb[0].mxu0 %v15_v26  ;;  %344 = vmatmul.mubr.f32.vlgmr.msra.gmra.mrb[0].mxu1 %v23_v27 }
  0x25   :  { %334 = vmatprep.mubr.f32.mxu0 %v16_v28  ;;  %346 = vmatprep.mubr.f32.mxu1 %v24_v29 }
  0x28   :  { %335 = vmatmul.mubr.f32.gmra.mrb[2].mxu0 %v17_v30  ;;  %347 = vmatmul.mubr.f32.gmra.mrb[2].mxu1 %v25_v31 }
  0x29   :  { %337 = vmatprep.mubr.f32.mxu0 %v18_v32  ;;  %349 = vmatprep.mubr.f32.mxu1 %v26_v33 }
  0x2c   :  { %338 = vmatmul.mubr.f32.gmra.mrb[4].mxu0 %v19_v34  ;;  %350 = vmatmul.mubr.f32.gmra.mrb[4].mxu1 %v27_v35 }
  0x2d   :  { %340 = vmatprep.mubr.f32.mxu0 %v20_v36  ;;  %352 = vmatprep.mubr.f32.mxu1 %v28_v37 }
  0x30   :  { %341 = vmatmul.mubr.f32.gmra.mrb[6].mxu0 %v21_v38  ;;  %353 = vmatmul.mubr.f32.gmra.mrb[6].mxu1 %v29_v39 }
  0xf7   :  { %v333_v41 = vpop.f32.mrb[0].mxu0  ;;  %v345_v42 = vpop.f32.mrb[0].mxu1 }
  0xf8   :  { %v125_v43 = vadd.f32 %v333_v41, %v522_v40  ;;  %v165_v44 = vadd.f32 %v345_v42, %v522_v40  ;;  %v119_v45 = vpop.f32.mrb[1].mxu0  ;;  %v159_v46 = vpop.f32.mrb[1].mxu1 }
  0xf9   :  { %v120_v47 = vadd.f32 %v522_v40, %v119_v45  ;;  %v160_v48 = vadd.f32 %v522_v40, %v159_v46 }
  0xfa   :  { %vm199_vm0 = vcmp.gt.f32.partialorder %v125_v43, 0.0  ;;  %v215_v49 = vmul.f32 0.01, %v125_v43  ;;  %vm207_vm1 = vcmp.gt.f32.partialorder %v165_v44, 0.0  ;;  %v223_v50 = vmul.f32 0.01, %v165_v44 }
  0xfb   :  { %vm198_vm2 = vcmp.gt.f32.partialorder %v120_v47, 0.0  ;;  %v214_v51 = vmul.f32 0.01, %v120_v47  ;;  %vm206_vm3 = vcmp.gt.f32.partialorder %v160_v48, 0.0  ;;  %v222_v52 = vmul.f32 0.01, %v160_v48 }
  0xfc   :  { %v231_v53 = vsel %vm199_vm0, %v125_v43, %v215_v49  ;;  %v239_v54 = vsel %vm207_vm1, %v165_v44, %v223_v50  ;;  %v336_v55 = vpop.f32.mrb[2].mxu0  ;;  %v348_v56 = vpop.f32.mrb[2].mxu1 }
  0xfd   :  { %247 = vst [vmem:[%s591_s3 + $0x8] sm:$0xff] %v231_v53  ;;  %255 = vst [vmem:[%s591_s3 + $0x48] sm:$0xff] %v239_v54  ;;  %v230_v57 = vsel %vm198_vm2, %v120_v47, %v214_v51  ;;  %v238_v58 = vsel %vm206_vm3, %v160_v48, %v222_v52  ;;  %v135_v59 = vadd.f32 %v336_v55, %v522_v40  ;;  %v129_v61 = vpop.f32.mrb[3].mxu0  ;;  %v169_v62 = vpop.f32.mrb[3].mxu1 }
  0xfe   :  { %v175_v60 = vadd.f32 %v348_v56, %v522_v40  ;;  %246 = vst [vmem:[%s591_s3] sm:$0xff] %v230_v57  ;;  %254 = vst [vmem:[%s591_s3 + $0x40] sm:$0xff] %v238_v58  ;;  %v130_v63 = vadd.f32 %v522_v40, %v129_v61  ;;  %v170_v0 = vadd.f32 %v522_v40, %v169_v62 }
  0xff   :  { %vm201_vm4 = vcmp.gt.f32.partialorder %v135_v59, 0.0  ;;  %v217_v1 = vmul.f32 0.01, %v135_v59  ;;  %v339_v7 = vpop.f32.mrb[4].mxu0  ;;  %v351_v8 = vpop.f32.mrb[4].mxu1 }
 0x100   :  { %vm209_vm5 = vcmp.gt.f32.partialorder %v175_v60, 0.0  ;;  %v225_v2 = vmul.f32 0.01, %v175_v60  ;;  %vm200_vm6 = vcmp.gt.f32.partialorder %v130_v63, 0.0  ;;  %v216_v3 = vmul.f32 0.01, %v130_v63 }
 0x101   :  { %vm208_vm7 = vcmp.gt.f32.partialorder %v170_v0, 0.0  ;;  %v224_v4 = vmul.f32 0.01, %v170_v0  ;;  %v233_v5 = vsel %vm201_vm4, %v135_v59, %v217_v1  ;;  %v145_v11 = vadd.f32 %v339_v7, %v522_v40  ;;  %v139_v13 = vpop.f32.mrb[5].mxu0  ;;  %v179_v14 = vpop.f32.mrb[5].mxu1 }
 0x102   :  { %v241_v6 = vsel %vm209_vm5, %v175_v60, %v225_v2  ;;  %249 = vst [vmem:[%s591_s3 + $0x18] sm:$0xff] %v233_v5  ;;  %v232_v9 = vsel %vm200_vm6, %v130_v63, %v216_v3  ;;  %v185_v12 = vadd.f32 %v351_v8, %v522_v40  ;;  %v140_v15 = vadd.f32 %v522_v40, %v139_v13 }
 0x103   :  { %257 = vst [vmem:[%s591_s3 + $0x58] sm:$0xff] %v241_v6  ;;  %v240_v10 = vsel %vm208_vm7, %v170_v0, %v224_v4  ;;  %248 = vst [vmem:[%s591_s3 + $0x10] sm:$0xff] %v232_v9  ;;  %v180_v16 = vadd.f32 %v522_v40, %v179_v14  ;;  %v342_v17 = vpop.f32.mrb[6].mxu0  ;;  %v354_v18 = vpop.f32.mrb[6].mxu1  ;;  %vm203_vm8 = vcmp.gt.f32.partialorder %v145_v11, 0.0 }
 0x104   :  { %256 = vst [vmem:[%s591_s3 + $0x50] sm:$0xff] %v240_v10  ;;  %v219_v19 = vmul.f32 0.01, %v145_v11  ;;  %vm211_vm9 = vcmp.gt.f32.partialorder %v185_v12, 0.0  ;;  %v227_v20 = vmul.f32 0.01, %v185_v12  ;;  %v155_v25 = vadd.f32 %v342_v17, %v522_v40 }
 0x105   :  { %vm202_vm10 = vcmp.gt.f32.partialorder %v140_v15, 0.0  ;;  %v218_v21 = vmul.f32 0.01, %v140_v15  ;;  %vm210_vm11 = vcmp.gt.f32.partialorder %v180_v16, 0.0  ;;  %v226_v22 = vmul.f32 0.01, %v180_v16 }
 0x106   :  { %v235_v23 = vsel %vm203_vm8, %v145_v11, %v219_v19  ;;  %v243_v24 = vsel %vm211_vm9, %v185_v12, %v227_v20  ;;  %v195_v26 = vadd.f32 %v354_v18, %v522_v40  ;;  %v149_v27 = vpop.f32.mrb[7].mxu0  ;;  %v189_v28 = vpop.f32.mrb[7].mxu1  ;;  %vm205_vm12 = vcmp.gt.f32.partialorder %v155_v25, 0.0 }
 0x107   :  { %251 = vst [vmem:[%s591_s3 + $0x28] sm:$0xff] %v235_v23  ;;  %259 = vst [vmem:[%s591_s3 + $0x68] sm:$0xff] %v243_v24  ;;  %v234_v29 = vsel %vm202_vm10, %v140_v15, %v218_v21  ;;  %v242_v30 = vsel %vm210_vm11, %v180_v16, %v226_v22  ;;  %v150_v31 = vadd.f32 %v522_v40, %v149_v27  ;;  %v221_v33 = vmul.f32 0.01, %v155_v25 }
 0x108   :  { %v190_v32 = vadd.f32 %v522_v40, %v189_v28  ;;  %250 = vst [vmem:[%s591_s3 + $0x20] sm:$0xff] %v234_v29  ;;  %258 = vst [vmem:[%s591_s3 + $0x60] sm:$0xff] %v242_v30  ;;  %vm213_vm13 = vcmp.gt.f32.partialorder %v195_v26, 0.0  ;;  %v229_v34 = vmul.f32 0.01, %v195_v26 }
 0x109   :  { %vm204_vm14 = vcmp.gt.f32.partialorder %v150_v31, 0.0  ;;  %v220_v35 = vmul.f32 0.01, %v150_v31  ;;  %v237_v37 = vsel %vm205_vm12, %v155_v25, %v221_v33 }
 0x10a   :  { %vm212_vm15 = vcmp.gt.f32.partialorder %v190_v32, 0.0  ;;  %v228_v36 = vmul.f32 0.01, %v190_v32  ;;  %v245_v38 = vsel %vm213_vm13, %v195_v26, %v229_v34  ;;  %253 = vst [vmem:[%s591_s3 + $0x38] sm:$0xff] %v237_v37 }
 0x10b   :  { %261 = vst [vmem:[%s591_s3 + $0x78] sm:$0xff] %v245_v38  ;;  %v236_v39 = vsel %vm204_vm14, %v150_v31, %v220_v35 }
 0x10c   :  { %v244_v40 = vsel %vm212_vm15, %v190_v32, %v228_v36  ;;  %252 = vst [vmem:[%s591_s3 + $0x30] sm:$0xff] %v236_v39 }
 0x10d   :  { %260 = vst [vmem:[%s591_s3 + $0x70] sm:$0xff] %v244_v40 }

// kernel: block_forward.7
= control target key start
LH: loop header
LB: loop body
LE: loop exit
PB: predicated region body
PF: predicated region fallthrough
CT: control target
= control target key end

     0   :  { %s676_s1 = inlined_call_operand.vmem [shape: f32[128,128], index: 1, kind: input, shape index: {}]   ;;  %s677_s0 = inlined_call_operand.vmem [shape: f32[128,128], index: 0, kind: input, shape index: {}]   ;;  %s678_s2 = inlined_call_operand.vmem [shape: f32[1,128], index: 2, kind: input, shape index: {}]   ;;  %s679_s3 = inlined_call_operand.vmem [shape: f32[128,128], index: 3, kind: input, shape index: {}]   ;;  %s680_s4 = inlined_call_operand.vmem [shape: f32[128,128], index: 4, kind: output, shape index: {}]  }
   0x1   :  { %v33_v0 = vld [vmem:[%s676_s1] sm:$0xff]  ;;  %v34_v1 = vld [vmem:[%s676_s1 + $0x8] sm:$0xff]  ;;  %v35_v2 = vld [vmem:[%s676_s1 + $0x10] sm:$0xff] }
   0x2   :  { %v390_v3 = vpack.c.bf16 %v34_v1, %v33_v0  ;;  %v36_v4 = vld [vmem:[%s676_s1 + $0x18] sm:$0xff]  ;;  %v37_v6 = vld [vmem:[%s676_s1 + $0x20] sm:$0xff]  ;;  %v38_v7 = vld [vmem:[%s676_s1 + $0x28] sm:$0xff] }
   0x3   :  { %v394_v5 = vpack.c.bf16 %v36_v4, %v35_v2  ;;  %v398_v8 = vpack.c.bf16 %v38_v7, %v37_v6  ;;  %v17_v9 = vld [vmem:[%s677_s0] sm:$0xff]  ;;  %v39_v11 = vld [vmem:[%s676_s1 + $0x30] sm:$0xff]  ;;  %v40_v12 = vld [vmem:[%s676_s1 + $0x38] sm:$0xff] }
   0x4   :  { %391 = vmatprep.subr.bf16.mxu0 %v390_v3  ;;  %422 = vmatprep.subr.bf16.mxu1 %v390_v3  ;;  %v25_v10 = vld [vmem:[%s677_s0 + $0x40] sm:$0xff]  ;;  %v402_v13 = vpack.c.bf16 %v40_v12, %v39_v11  ;;  %v42_v15 = vld [vmem:[%s676_s1 + $0x48] sm:$0xff]  ;;  %v43_v17 = vld [vmem:[%s676_s1 + $0x50] sm:$0xff] }
   0x5   :  { %393 = vmatpush3.bf16.msra.mxu0 %v390_v3  ;;  %430 = vmatpush3.bf16.msra.mxu1 %v390_v3  ;;  %v41_v14 = vld [vmem:[%s676_s1 + $0x40] sm:$0xff]  ;;  %v44_v18 = vld [vmem:[%s676_s1 + $0x58] sm:$0xff]  ;;  %v46_v21 = vld [vmem:[%s676_s1 + $0x68] sm:$0xff] }
   0x6   :  { %395 = vmatprep.subr.bf16.mxu0 %v394_v5  ;;  %423 = vmatprep.subr.bf16.mxu1 %v394_v5  ;;  %v406_v16 = vpack.c.bf16 %v42_v15, %v41_v14  ;;  %v410_v19 = vpack.c.bf16 %v44_v18, %v43_v17  ;;  %v45_v20 = vld [vmem:[%s676_s1 + $0x60] sm:$0xff]  ;;  %v47_v23 = vld [vmem:[%s676_s1 + $0x70] sm:$0xff]  ;;  %v48_v24 = vld [vmem:[%s676_s1 + $0x78] sm:$0xff] }
   0x7   :  { %366 = vmatprep.mubr.f32.mxu0 %v17_v9  ;;  %378 = vmatprep.mubr.f32.mxu1 %v25_v10  ;;  %v414_v22 = vpack.c.bf16 %v46_v21, %v45_v20  ;;  %v418_v25 = vpack.c.bf16 %v48_v24, %v47_v23  ;;  %v18_v26 = vld [vmem:[%s677_s0 + $0x8] sm:$0xff]  ;;  %v19_v28 = vld [vmem:[%s677_s0 + $0x10] sm:$0xff]  ;;  %v20_v30 = vld [vmem:[%s677_s0 + $0x18] sm:$0xff] }
   0x8   :  { %v26_v27 = vld [vmem:[%s677_s0 + $0x48] sm:$0xff]  ;;  %v27_v29 = vld [vmem:[%s677_s0 + $0x50] sm:$0xff]  ;;  %v28_v31 = vld [vmem:[%s677_s0 + $0x58] sm:$0xff] }
   0x9   :  { %397 = vmatpush3.bf16.msra.mxu0 %v394_v5  ;;  %431 = vmatpush3.bf16.msra.mxu1 %v394_v5  ;;  %v21_v32 = vld [vmem:[%s677_s0 + $0x20] sm:$0xff]  ;;  %v22_v34 = vld [vmem:[%s677_s0 + $0x28] sm:$0xff]  ;;  %v23_v36 = vld [vmem:[%s677_s0 + $0x30] sm:$0xff] }
   0xa   :  { %399 = vmatprep.subr.bf16.mxu0 %v398_v8  ;;  %424 = vmatprep.subr.bf16.mxu1 %v398_v8  ;;  %v29_v33 = vld [vmem:[%s677_s0 + $0x60] sm:$0xff]  ;;  %v30_v35 = vld [vmem:[%s677_s0 + $0x68] sm:$0xff]  ;;  %v31_v37 = vld [vmem:[%s677_s0 + $0x70] sm:$0xff] }
   0xb   :  { %v24_v38 = vld [vmem:[%s677_s0 + $0x38] sm:$0xff]  ;;  %v562_v40 = vld [vmem:[%s678_s2] ss:$0 sm:$0xff]  ;;  %v202_v42 = vld [vmem:[%s679_s3 + $0x8] sm:$0xff] }
   0xc   :  { %v32_v39 = vld [vmem:[%s677_s0 + $0x78] sm:$0xff]  ;;  %v210_v44 = vld [vmem:[%s679_s3 + $0x48] sm:$0xff]  ;;  %v201_v48 = vld [vmem:[%s679_s3] sm:$0xff] }
   0xd   :  { %401 = vmatpush3.bf16.msra.mxu0 %v398_v8  ;;  %432 = vmatpush3.bf16.msra.mxu1 %v398_v8  ;;  %v209_v50 = vld [vmem:[%s679_s3 + $0x40] sm:$0xff]  ;;  %v204_v58 = vld [vmem:[%s679_s3 + $0x18] sm:$0xff]  ;;  %v203_v6 = vld [vmem:[%s679_s3 + $0x10] sm:$0xff] }
   0xe   :  { %403 = vmatprep.subr.bf16.mxu0 %v402_v13  ;;  %425 = vmatprep.subr.bf16.mxu1 %v402_v13  ;;  %v212_v60 = vld [vmem:[%s679_s3 + $0x58] sm:$0xff]  ;;  %v211_v8 = vld [vmem:[%s679_s3 + $0x50] sm:$0xff]  ;;  %v206_v18 = vld [vmem:[%s679_s3 + $0x28] sm:$0xff] }
   0xf   :  { %v214_v24 = vld [vmem:[%s679_s3 + $0x68] sm:$0xff] }
  0x11   :  { %405 = vmatpush3.bf16.msra.mxu0 %v402_v13  ;;  %433 = vmatpush3.bf16.msra.mxu1 %v402_v13 }
  0x12   :  { %407 = vmatprep.subr.bf16.mxu0 %v406_v16  ;;  %426 = vmatprep.subr.bf16.mxu1 %v406_v16 }
  0x15   :  { %409 = vmatpush3.bf16.msra.mxu0 %v406_v16  ;;  %434 = vmatpush3.bf16.msra.mxu1 %v406_v16 }
  0x16   :  { %411 = vmatprep.subr.bf16.mxu0 %v410_v19  ;;  %427 = vmatprep.subr.bf16.mxu1 %v410_v19 }
  0x19   :  { %413 = vmatpush3.bf16.msra.mxu0 %v410_v19  ;;  %435 = vmatpush3.bf16.msra.mxu1 %v410_v19 }
  0x1a   :  { %415 = vmatprep.subr.bf16.mxu0 %v414_v22  ;;  %428 = vmatprep.subr.bf16.mxu1 %v414_v22 }
  0x1d   :  { %417 = vmatpush3.bf16.msra.mxu0 %v414_v22  ;;  %436 = vmatpush3.bf16.msra.mxu1 %v414_v22 }
  0x1e   :  { %419 = vmatprep.subr.bf16.mxu0 %v418_v25  ;;  %429 = vmatprep.subr.bf16.mxu1 %v418_v25 }
  0x21   :  { %421 = vmatpush3.bf16.msra.mxu0 %v418_v25  ;;  %437 = vmatpush3.bf16.msra.mxu1 %v418_v25 }
  0x24   :  { %367 = vmatmul.mubr.f32.vlgmr.msra.gmra.mrb[0].mxu0 %v18_v26  ;;  %379 = vmatmul.mubr.f32.vlgmr.msra.gmra.mrb[0].mxu1 %v26_v27  ;;  %v205_v26 = vld [vmem:[%s679_s3 + $0x20] sm:$0xff] }
  0x25   :  { %369 = vmatprep.mubr.f32.mxu0 %v19_v28  ;;  %381 = vmatprep.mubr.f32.mxu1 %v27_v29  ;;  %v213_v28 = vld [vmem:[%s679_s3 + $0x60] sm:$0xff] }
  0x28   :  { %370 = vmatmul.mubr.f32.gmra.mrb[2].mxu0 %v20_v30  ;;  %382 = vmatmul.mubr.f32.gmra.mrb[2].mxu1 %v28_v31 }
  0x29   :  { %372 = vmatprep.mubr.f32.mxu0 %v21_v32  ;;  %384 = vmatprep.mubr.f32.mxu1 %v29_v33 }
  0x2c   :  { %373 = vmatmul.mubr.f32.gmra.mrb[4].mxu0 %v22_v34  ;;  %385 = vmatmul.mubr.f32.gmra.mrb[4].mxu1 %v30_v35 }
  0x2d   :  { %375 = vmatprep.mubr.f32.mxu0 %v23_v36  ;;  %387 = vmatprep.mubr.f32.mxu1 %v31_v37 }
  0x30   :  { %376 = vmatmul.mubr.f32.gmra.mrb[6].mxu0 %v24_v38  ;;  %388 = vmatmul.mubr.f32.gmra.mrb[6].mxu1 %v32_v39 }
  0xf7   :  { %v368_v41 = vpop.f32.mrb[0].mxu0  ;;  %v380_v43 = vpop.f32.mrb[0].mxu1 }
  0xf8   :  { %v128_v45 = vadd.f32 %v368_v41, %v562_v40  ;;  %v168_v46 = vadd.f32 %v380_v43, %v562_v40  ;;  %v122_v47 = vpop.f32.mrb[1].mxu0  ;;  %v162_v49 = vpop.f32.mrb[1].mxu1 }
  0xf9   :  { %v123_v51 = vadd.f32 %v562_v40, %v122_v47  ;;  %v163_v52 = vadd.f32 %v562_v40, %v162_v49 }
  0xfa   :  { %v218_v53 = vadd.f32 %v202_v42, %v128_v45  ;;  %v226_v54 = vadd.f32 %v210_v44, %v168_v46  ;;  %v208_v44 = vld [vmem:[%s679_s3 + $0x38] sm:$0xff] }
  0xfb   :  { %v217_v55 = vadd.f32 %v201_v48, %v123_v51  ;;  %v225_v56 = vadd.f32 %v209_v50, %v163_v52  ;;  %v371_v57 = vpop.f32.mrb[2].mxu0  ;;  %v383_v59 = vpop.f32.mrb[2].mxu1  ;;  %v216_v45 = vld [vmem:[%s679_s3 + $0x78] sm:$0xff] }
  0xfc   :  { %vm234_vm0 = vcmp.gt.f32.partialorder %v218_v53, 0.0  ;;  %v250_v61 = vmul.f32 0.01, %v218_v53  ;;  %vm242_vm1 = vcmp.gt.f32.partialorder %v226_v54, 0.0  ;;  %v258_v62 = vmul.f32 0.01, %v226_v54 }
  0xfd   :  { %vm233_vm2 = vcmp.gt.f32.partialorder %v217_v55, 0.0  ;;  %v249_v63 = vmul.f32 0.01, %v217_v55  ;;  %vm241_vm3 = vcmp.gt.f32.partialorder %v225_v56, 0.0  ;;  %v257_v0 = vmul.f32 0.01, %v225_v56 }
  0xfe   :  { %v266_v1 = vsel %vm234_vm0, %v218_v53, %v250_v61  ;;  %v274_v2 = vsel %vm242_vm1, %v226_v54, %v258_v62  ;;  %v138_v3 = vadd.f32 %v371_v57, %v562_v40  ;;  %v178_v4 = vadd.f32 %v383_v59, %v562_v40  ;;  %v132_v5 = vpop.f32.mrb[3].mxu0  ;;  %v172_v7 = vpop.f32.mrb[3].mxu1  ;;  %v215_v57 = vld [vmem:[%s679_s3 + $0x70] sm:$0xff] }
  0xff   :  { %282 = vst [vmem:[%s680_s4 + $0x8] sm:$0xff] %v266_v1  ;;  %290 = vst [vmem:[%s680_s4 + $0x48] sm:$0xff] %v274_v2  ;;  %v265_v9 = vsel %vm233_vm2, %v217_v55, %v249_v63  ;;  %v273_v10 = vsel %vm241_vm3, %v225_v56, %v257_v0  ;;  %v133_v11 = vadd.f32 %v562_v40, %v132_v5  ;;  %v374_v13 = vpop.f32.mrb[4].mxu0  ;;  %v386_v14 = vpop.f32.mrb[4].mxu1  ;;  %v207_v56 = vld [vmem:[%s679_s3 + $0x30] sm:$0xff] }
 0x100   :  { %v173_v12 = vadd.f32 %v562_v40, %v172_v7  ;;  %281 = vst [vmem:[%s680_s4] sm:$0xff] %v265_v9  ;;  %289 = vst [vmem:[%s680_s4 + $0x40] sm:$0xff] %v273_v10  ;;  %v220_v15 = vadd.f32 %v204_v58, %v138_v3  ;;  %v228_v16 = vadd.f32 %v212_v60, %v178_v4  ;;  %v142_v20 = vpop.f32.mrb[5].mxu0  ;;  %v182_v21 = vpop.f32.mrb[5].mxu1 }
 0x101   :  { %v148_v17 = vadd.f32 %v374_v13, %v562_v40  ;;  %v188_v19 = vadd.f32 %v386_v14, %v562_v40  ;;  %v219_v22 = vadd.f32 %v203_v6, %v133_v11  ;;  %v143_v25 = vadd.f32 %v562_v40, %v142_v20 }
 0x102   :  { %v227_v23 = vadd.f32 %v211_v8, %v173_v12  ;;  %v183_v27 = vadd.f32 %v562_v40, %v182_v21  ;;  %vm236_vm4 = vcmp.gt.f32.partialorder %v220_v15, 0.0  ;;  %v252_v29 = vmul.f32 0.01, %v220_v15 }
 0x103   :  { %vm244_vm5 = vcmp.gt.f32.partialorder %v228_v16, 0.0  ;;  %v260_v30 = vmul.f32 0.01, %v228_v16  ;;  %vm235_vm6 = vcmp.gt.f32.partialorder %v219_v22, 0.0  ;;  %v251_v31 = vmul.f32 0.01, %v219_v22 }
 0x104   :  { %vm243_vm7 = vcmp.gt.f32.partialorder %v227_v23, 0.0  ;;  %v259_v32 = vmul.f32 0.01, %v227_v23  ;;  %v268_v33 = vsel %vm236_vm4, %v220_v15, %v252_v29  ;;  %v222_v35 = vadd.f32 %v206_v18, %v148_v17  ;;  %v377_v37 = vpop.f32.mrb[6].mxu0  ;;  %v389_v38 = vpop.f32.mrb[6].mxu1 }
 0x105   :  { %v276_v34 = vsel %vm244_vm5, %v228_v16, %v260_v30  ;;  %v230_v36 = vadd.f32 %v214_v24, %v188_v19  ;;  %284 = vst [vmem:[%s680_s4 + $0x18] sm:$0xff] %v268_v33  ;;  %v267_v39 = vsel %vm235_vm6, %v219_v22, %v251_v31  ;;  %v221_v42 = vadd.f32 %v205_v26, %v143_v25  ;;  %v152_v46 = vpop.f32.mrb[7].mxu0  ;;  %v192_v47 = vpop.f32.mrb[7].mxu1 }
 0x106   :  { %292 = vst [vmem:[%s680_s4 + $0x58] sm:$0xff] %v276_v34  ;;  %v275_v41 = vsel %vm243_vm7, %v227_v23, %v259_v32  ;;  %v229_v43 = vadd.f32 %v213_v28, %v183_v27  ;;  %283 = vst [vmem:[%s680_s4 + $0x10] sm:$0xff] %v267_v39  ;;  %vm238_vm8 = vcmp.gt.f32.partialorder %v222_v35, 0.0  ;;  %v254_v48 = vmul.f32 0.01, %v222_v35 }
 0x107   :  { %291 = vst [vmem:[%s680_s4 + $0x50] sm:$0xff] %v275_v41  ;;  %vm246_vm9 = vcmp.gt.f32.partialorder %v230_v36, 0.0  ;;  %v262_v49 = vmul.f32 0.01, %v230_v36  ;;  %vm237_vm10 = vcmp.gt.f32.partialorder %v221_v42, 0.0  ;;  %v158_v54 = vadd.f32 %v377_v37, %v562_v40 }
 0x108   :  { %v253_v50 = vmul.f32 0.01, %v221_v42  ;;  %vm245_vm11 = vcmp.gt.f32.partialorder %v229_v43, 0.0  ;;  %v261_v51 = vmul.f32 0.01, %v229_v43  ;;  %v270_v52 = vsel %vm238_vm8, %v222_v35, %v254_v48 }
 0x109   :  { %v278_v53 = vsel %vm246_vm9, %v230_v36, %v262_v49  ;;  %v198_v55 = vadd.f32 %v389_v38, %v562_v40  ;;  %286 = vst [vmem:[%s680_s4 + $0x28] sm:$0xff] %v270_v52  ;;  %v153_v60 = vadd.f32 %v562_v40, %v152_v46  ;;  %v193_v61 = vadd.f32 %v562_v40, %v192_v47 }
 0x10a   :  { %294 = vst [vmem:[%s680_s4 + $0x68] sm:$0xff] %v278_v53  ;;  %v269_v58 = vsel %vm237_vm10, %v221_v42, %v253_v50  ;;  %v277_v59 = vsel %vm245_vm11, %v229_v43, %v261_v51  ;;  %v224_v62 = vadd.f32 %v208_v44, %v158_v54 }
 0x10b   :  { %285 = vst [vmem:[%s680_s4 + $0x20] sm:$0xff] %v269_v58  ;;  %293 = vst [vmem:[%s680_s4 + $0x60] sm:$0xff] %v277_v59  ;;  %v232_v63 = vadd.f32 %v216_v45, %v198_v55  ;;  %v223_v0 = vadd.f32 %v207_v56, %v153_v60  ;;  %v231_v1 = vadd.f32 %v215_v57, %v193_v61 }
 0x10c   :  { %vm240_vm12 = vcmp.gt.f32.partialorder %v224_v62, 0.0  ;;  %v256_v2 = vmul.f32 0.01, %v224_v62 }
 0x10d   :  { %vm248_vm13 = vcmp.gt.f32.partialorder %v232_v63, 0.0  ;;  %v264_v3 = vmul.f32 0.01, %v232_v63  ;;  %vm239_vm14 = vcmp.gt.f32.partialorder %v223_v0, 0.0  ;;  %v255_v4 = vmul.f32 0.01, %v223_v0 }
 0x10e   :  { %vm247_vm15 = vcmp.gt.f32.partialorder %v231_v1, 0.0  ;;  %v263_v40 = vmul.f32 0.01, %v231_v1  ;;  %v272_v5 = vsel %vm240_vm12, %v224_v62, %v256_v2 }
 0x10f   :  { %v280_v6 = vsel %vm248_vm13, %v232_v63, %v264_v3  ;;  %288 = vst [vmem:[%s680_s4 + $0x38] sm:$0xff] %v272_v5  ;;  %v271_v7 = vsel %vm239_vm14, %v223_v0, %v255_v4 }
 0x110   :  { %296 = vst [vmem:[%s680_s4 + $0x78] sm:$0xff] %v280_v6  ;;  %v279_v8 = vsel %vm247_vm15, %v231_v1, %v263_v40  ;;  %287 = vst [vmem:[%s680_s4 + $0x30] sm:$0xff] %v271_v7 }
 0x111   :  { %295 = vst [vmem:[%s680_s4 + $0x70] sm:$0xff] %v279_v8 }

</bundles_post_ra>
